<compile_context>
chip_gen: v6e
topology: v6e:2x2x1
jax: 0.10.0
libtpu: 0.0.40
codegen_flags: <defaults>
</compile_context>

<pallas_src>
import functools
import numpy as np
import jax
import jax.numpy as jnp
from jax.experimental import pallas as pl
from jax.experimental.pallas import tpu as pltpu

_VMEM_LIMIT = 32 * 1024 * 1024   # explicit scoped-VMEM budget, safe on v5e/v6e/v7x


def _round_up(x, m):
    return (x + m - 1) // m * m


def _tile_cap(budget_bytes, k, granule):
    # Largest tile (multiple of `granule`) such that a double-buffered bf16
    # (tile, k) block stays under `budget_bytes`.
    cap = budget_bytes // max(2 * 2 * k, 1)
    return max(granule, cap // granule * granule)


# ---------------------------------------------------------------------------
# Kernels
# ---------------------------------------------------------------------------
def _conv_bias_kernel(p_ref, w_ref, b_ref, o_ref, *, use_lrelu, slope=0.2):
    # p_ref: (tile_m, K) bf16, w_ref: (K, tile_c) bf16, b_ref: (1, tile_c) f32
    y = jnp.dot(p_ref[...], w_ref[...], preferred_element_type=jnp.float32)
    y = y + b_ref[...]
    if use_lrelu:
        y = jnp.where(y > 0, y, slope * y)
    o_ref[...] = y.astype(o_ref.dtype)


def _conv_in_kernel(p_ref, w_ref, gb_ref, o_ref, sum_ref, ssq_ref, *,
                    tile_p, p_valid, eps=1e-5, slope=0.2):
    # Conv (GEMM, f32 accumulate) + InstanceNorm2d(affine) + LeakyReLU(0.2).
    # Grid axis 2 tiles the spatial (P) dimension of one (sample, C-tile).
    pi = pl.program_id(2)

    @pl.when(pi == 0)
    def _():
        sum_ref[...] = jnp.zeros_like(sum_ref)
        ssq_ref[...] = jnp.zeros_like(ssq_ref)

    y = jnp.dot(p_ref[...], w_ref[...], preferred_element_type=jnp.float32)  # (tile_p, tile_c)
    sum_ref[...] += jnp.sum(y, axis=0, keepdims=True)
    ssq_ref[...] += jnp.sum(y * y, axis=0, keepdims=True)
    off = pl.multiple_of(pi * tile_p, tile_p)
    o_ref[pl.ds(off, tile_p), :] = y.astype(o_ref.dtype)   # stash pre-norm activations

    @pl.when(pi == pl.num_programs(2) - 1)
    def _():
        # Biased variance over the FULL spatial extent. Padded rows are exact
        # zeros (no bias in InstanceNorm convs) so they contribute nothing to
        # sum/sumsq; divide by the real spatial size p_valid.
        inv_p = 1.0 / p_valid
        mean = sum_ref[...] * inv_p
        var = jnp.maximum(ssq_ref[...] * inv_p - mean * mean, 0.0)
        inv_std = jax.lax.rsqrt(var + eps)
        gamma = gb_ref[0:1, :]
        beta = gb_ref[1:2, :]
        y_all = o_ref[...].astype(jnp.float32)              # resident per-(sample, C-tile) block
        y_n = (y_all - mean) * inv_std * gamma + beta
        y_n = jnp.where(y_n > 0, y_n, slope * y_n)
        o_ref[...] = y_n.astype(o_ref.dtype)


# ---------------------------------------------------------------------------
# im2col + layer wrappers
# ---------------------------------------------------------------------------
def _im2col(x_nhwc, kh, kw, stride, pad):
    x = jnp.pad(x_nhwc, ((0, 0), (pad, pad), (pad, pad), (0, 0)))
    n, h, w, c = x.shape
    ho = (h - kh) // stride + 1
    wo = (w - kw) // stride + 1
    cols = []
    for i in range(kh):
        for j in range(kw):
            cols.append(x[:, i:i + ho * stride:stride, j:j + wo * stride:stride, :])
    patches = jnp.stack(cols, axis=3)               # (N, ho, wo, kh*kw, C)
    return patches.reshape(n, ho * wo, kh * kw * c), ho, wo


def _weight_matrix(w_oihw, c_pad):
    c_out, _, kh, kw = w_oihw.shape
    k = kh * kw * w_oihw.shape[1]
    # [C_out, C_in, KH, KW] -> [KH, KW, C_in, C_out] -> [K, C_out], matches the
    # (kh, kw, c_in) ordering of the im2col patches; zero-pad C_out to lane width.
    w_mat = jnp.transpose(w_oihw, (2, 3, 1, 0)).reshape(k, c_out)
    return jnp.pad(w_mat, ((0, 0), (0, c_pad - c_out))).astype(jnp.bfloat16)


def _conv_bias_layer(x_nhwc, w_oihw, bias, *, stride, pad, use_lrelu, out_dtype):
    c_out, _, kh, kw = w_oihw.shape
    patches, ho, wo = _im2col(x_nhwc, kh, kw, stride, pad)
    n, p, k = patches.shape

    c_pad = _round_up(c_out, 128)
    tile_c = min(c_pad, 512, _tile_cap(16 * 1024 * 1024, k, 128))
    m = n * p
    tile_m = min(1024, _round_up(m, 8), _tile_cap(8 * 1024 * 1024, k, 8))
    m_pad = _round_up(m, tile_m)

    pm = patches.reshape(m, k).astype(jnp.bfloat16)
    if m_pad != m:
        pm = jnp.pad(pm, ((0, m_pad - m), (0, 0)))
    w_mat = _weight_matrix(w_oihw, c_pad)
    b2 = jnp.pad(bias.astype(jnp.float32), (0, c_pad - c_out)).reshape(1, c_pad)

    grid = (m_pad // tile_m, c_pad // tile_c)
    flops = 2 * m_pad * k * c_pad
    bytes_accessed = (pm.size * 2 + w_mat.size * 2 * grid[0]
                      + m_pad * c_pad * jnp.dtype(out_dtype).itemsize)

    out = pl.pallas_call(
        functools.partial(_conv_bias_kernel, use_lrelu=use_lrelu),
        out_shape=jax.ShapeDtypeStruct((m_pad, c_pad), out_dtype),
        grid=grid,
        in_specs=[
            pl.BlockSpec((tile_m, k), lambda i, j: (i, 0)),
            pl.BlockSpec((k, tile_c), lambda i, j: (0, j)),
            pl.BlockSpec((1, tile_c), lambda i, j: (0, j)),
        ],
        out_specs=pl.BlockSpec((tile_m, tile_c), lambda i, j: (i, j)),
        compiler_params=pltpu.CompilerParams(
            dimension_semantics=("parallel", "parallel"),
            vmem_limit_bytes=_VMEM_LIMIT),
        cost_estimate=pl.CostEstimate(flops=flops, transcendentals=0,
                                      bytes_accessed=bytes_accessed),
    )(pm, w_mat, b2)
    return out[:m, :c_out].reshape(n, ho, wo, c_out)


def _conv_in_layer(x_nhwc, w_oihw, gamma, beta, *, stride, pad, out_dtype):
    c_out, _, kh, kw = w_oihw.shape
    patches, ho, wo = _im2col(x_nhwc, kh, kw, stride, pad)
    n, p, k = patches.shape

    c_pad = _round_up(c_out, 128)
    tile_c = min(c_pad, 512, _tile_cap(16 * 1024 * 1024, k, 128))
    tile_p = min(512, _round_up(p, 8), _tile_cap(8 * 1024 * 1024, k, 8))
    p_pad = _round_up(p, tile_p)

    pm = patches.astype(jnp.bfloat16)
    if p_pad != p:
        pm = jnp.pad(pm, ((0, 0), (0, p_pad - p), (0, 0)))
    w_mat = _weight_matrix(w_oihw, c_pad)
    gb = jnp.stack([
        jnp.pad(gamma.astype(jnp.float32), (0, c_pad - c_out), constant_values=1.0),
        jnp.pad(beta.astype(jnp.float32), (0, c_pad - c_out)),
    ], axis=0)                                               # (2, C_pad)

    n_ct = c_pad // tile_c
    n_pt = p_pad // tile_p
    grid = (n, n_ct, n_pt)
    flops = 2 * n * p_pad * k * c_pad
    bytes_accessed = (pm.size * 2 * n_ct + w_mat.size * 2 * n
                      + n * p_pad * c_pad * jnp.dtype(out_dtype).itemsize)

    out = pl.pallas_call(
        functools.partial(_conv_in_kernel, tile_p=tile_p, p_valid=float(p)),
        out_shape=jax.ShapeDtypeStruct((n, p_pad, c_pad), out_dtype),
        grid=grid,
        in_specs=[
            pl.BlockSpec((None, tile_p, k), lambda i, jc, jp: (i, jp, 0)),
            pl.BlockSpec((k, tile_c), lambda i, jc, jp: (0, jc)),
            pl.BlockSpec((2, tile_c), lambda i, jc, jp: (0, jc)),
        ],
        out_specs=pl.BlockSpec((None, p_pad, tile_c), lambda i, jc, jp: (i, 0, jc)),
        scratch_shapes=[pltpu.VMEM((1, tile_c), jnp.float32),
                        pltpu.VMEM((1, tile_c), jnp.float32)],
        compiler_params=pltpu.CompilerParams(
            dimension_semantics=("parallel", "parallel", "arbitrary"),
            vmem_limit_bytes=_VMEM_LIMIT),
        cost_estimate=pl.CostEstimate(flops=flops, transcendentals=0,
                                      bytes_accessed=bytes_accessed),
    )(pm, w_mat, gb)
    return out[:, :p, :c_out].reshape(n, ho, wo, c_out)


def _final_conv_layer(x_nhwc, w_oihw, bias, *, stride, pad):
    c_out, c_in, kh, kw = w_oihw.shape
    n, h, w, _ = x_nhwc.shape
    if pad == 0 and h == kh and w == kw:
        # Degenerate conv (4x4 input, 1x1 output, c_out=1): one dot per sample.
        # A Pallas call would be pure fixed overhead here -> plain JAX.
        x_flat = x_nhwc.astype(jnp.float32).reshape(n, kh * kw * c_in)
        w_flat = jnp.transpose(w_oihw, (2, 3, 1, 0)).reshape(kh * kw * c_in, c_out)
        y = x_flat @ w_flat.astype(jnp.float32) + bias.astype(jnp.float32).reshape(1, c_out)
        return y.reshape(n, 1, 1, c_out)
    return _conv_bias_layer(x_nhwc, w_oihw, bias, stride=stride, pad=pad,
                            use_lrelu=False, out_dtype=jnp.float32)


# ---------------------------------------------------------------------------
# Parameters + forward
# ---------------------------------------------------------------------------
def init_discriminator_params(key, channels_img, features_d, image_size):
    num_layers = int(np.log2(image_size / 8))
    keys = jax.random.split(key, num_layers + 4)
    params = []
    params.append({
        'w': jax.random.normal(keys[0], (features_d, channels_img, 4, 4), jnp.float32) * 0.02,
        'b': jax.random.normal(keys[1], (features_d,), jnp.float32) * 0.02,
    })
    n = 1
    for i in range(num_layers):
        c_in, c_out = features_d * n, features_d * n * 2
        params.append({
            'w': jax.random.normal(keys[2 + i], (c_out, c_in, 4, 4), jnp.float32) * 0.02,
            'gamma': jnp.ones((c_out,), jnp.float32),    # InstanceNorm2d(affine) init
            'beta': jnp.zeros((c_out,), jnp.float32),
        })
        n *= 2
    params.append({
        'w': jax.random.normal(keys[2 + num_layers], (1, features_d * n, 4, 4), jnp.float32) * 0.02,
        'b': jax.random.normal(keys[3 + num_layers], (1,), jnp.float32) * 0.02,
    })
    return params


def discriminator_forward(img_nchw, params):
    # NCHW f32 -> NHWC bf16 (bf16 activations/patches between layers, f32 accumulate)
    x = jnp.transpose(img_nchw, (0, 2, 3, 1)).astype(jnp.bfloat16)
    # Conv2d(c_img, f_d, 4, 2, 1) + LeakyReLU(0.2)
    x = _conv_bias_layer(x, params[0]['w'], params[0]['b'], stride=2, pad=1,
                         use_lrelu=True, out_dtype=jnp.bfloat16)
    # repeated _block: Conv(4,2,1, bias=False) + InstanceNorm(affine) + LeakyReLU(0.2)
    for p in params[1:-1]:
        x = _conv_in_layer(x, p['w'], p['gamma'], p['beta'], stride=2, pad=1,
                           out_dtype=jnp.bfloat16)
    # final Conv2d(f_d * n, 1, 4, 2, 0)
    p = params[-1]
    x = _final_conv_layer(x, p['w'], p['b'], stride=2, pad=0)
    return jnp.transpose(x, (0, 3, 1, 2)).astype(jnp.float32)     # back to NCHW


# ---------------------------------------------------------------------------
# Pure-JAX f32 reference (lax conv) for a correctness sanity check
# ---------------------------------------------------------------------------
def _ref_forward(img, params):
    def conv(x, w, b, stride, pad):
        y = jax.lax.conv_general_dilated(
            x, w, (stride, stride), [(pad, pad), (pad, pad)],
            dimension_numbers=('NCHW', 'OIHW', 'NCHW'))
        if b is not None:
            y = y + b.reshape(1, -1, 1, 1)
        return y

    def lrelu(x):
        return jnp.where(x > 0, x, 0.2 * x)

    def inorm(x, g, bt, eps=1e-5):
        mean = x.mean(axis=(2, 3), keepdims=True)
        var = jnp.square(x - mean).mean(axis=(2, 3), keepdims=True)
        xh = (x - mean) * jax.lax.rsqrt(var + eps)
        return xh * g.reshape(1, -1, 1, 1) + bt.reshape(1, -1, 1, 1)

    x = lrelu(conv(img, params[0]['w'], params[0]['b'], 2, 1))
    for p in params[1:-1]:
        x = lrelu(inorm(conv(x, p['w'], None, 2, 1), p['gamma'], p['beta']))
    p = params[-1]
    return conv(x, p['w'], p['b'], 2, 0)


if __name__ == "__main__":
    # Small config consistent with the module: Discriminator(channels_img=4,
    # features_d=8, image_size=16) -> num_layers = log2(16/8) = 1
    batch, channels_img, features_d, image_size = 2, 4, 8, 16

    key = jax.random.PRNGKey(0)
    k_img, k_par = jax.random.split(key)
    img = jax.random.normal(k_img, (batch, channels_img, image_size, image_size),
                            jnp.float32)
    params = init_discriminator_params(k_par, channels_img, features_d, image_size)

    out = jax.block_until_ready(discriminator_forward(img, params))
    assert out.shape == (batch, 1, 1, 1), out.shape

    ref = jax.block_until_ready(_ref_forward(img, params))
    # bf16 MXU inputs / bf16 inter-layer activations (f32 accumulate) -> slightly
    # relaxed tolerance vs the pure-f32 reference.
    assert np.allclose(np.asarray(out), np.asarray(ref), rtol=5e-2, atol=5e-2), \
        (np.asarray(out), np.asarray(ref))

    print("KERNEL_OK")
</pallas_src>

<mosaic_0001>
module attributes {stable_mosaic.version = 11 : i64} {
  func.func @_conv_bias_kernel(%arg0: i32, %arg1: i32, %arg2: memref<128x64xbf16, #tpu.memory_space<vmem>>, %arg3: memref<64x128xbf16, #tpu.memory_space<vmem>>, %arg4: memref<1x128xf32, #tpu.memory_space<vmem>>, %arg5: memref<128x128xbf16, #tpu.memory_space<vmem>>) attributes {dimension_semantics = [#tpu.dimension_semantics<parallel>, #tpu.dimension_semantics<parallel>], iteration_bounds = array<i64: 1, 1>, scalar_prefetch = 0 : i64, scratch_operands = 0 : i64, tpu.core_type = #tpu.core_type<tc>, window_params = [{transform_indices = @transform_0, window_bounds = array<i64: 128, 64>}, {transform_indices = @transform_1, window_bounds = array<i64: 64, 128>}, {transform_indices = @transform_2, window_bounds = array<i64: 1, 128>}, {transform_indices = @transform_3, window_bounds = array<i64: 128, 128>}]} {
    %c0 = arith.constant 0 : index
    %c0_0 = arith.constant 0 : index
    %0 = vector.load %arg2[%c0, %c0_0] : memref<128x64xbf16, #tpu.memory_space<vmem>>, vector<128x64xbf16>
    %c0_1 = arith.constant 0 : index
    %c0_2 = arith.constant 0 : index
    %1 = vector.load %arg3[%c0_1, %c0_2] : memref<64x128xbf16, #tpu.memory_space<vmem>>, vector<64x128xbf16>
    %cst = arith.constant dense<0.000000e+00> : vector<128x128xf32>
    %2 = tpu.matmul %0, %1, %cst {dimension_numbers = #tpu.dot_dimension_numbers<[1], [0], [0], [1], [0, 0, 1, 1], [], []>} : vector<128x64xbf16>, vector<64x128xbf16>, vector<128x128xf32> -> vector<128x128xf32>
    %c0_3 = arith.constant 0 : index
    %c0_4 = arith.constant 0 : index
    %3 = vector.load %arg4[%c0_3, %c0_4] : memref<1x128xf32, #tpu.memory_space<vmem>>, vector<1x128xf32>
    %4 = vector.broadcast %3 : vector<1x128xf32> to vector<128x128xf32>
    %5 = arith.addf %2, %4 : vector<128x128xf32>
    %cst_5 = arith.constant 0.000000e+00 : f32
    %6 = vector.broadcast %cst_5 : f32 to vector<128x128xf32>
    %7 = arith.cmpf ogt, %5, %6 : vector<128x128xf32>
    %cst_6 = arith.constant 2.000000e-01 : f32
    %8 = vector.broadcast %cst_6 : f32 to vector<128x128xf32>
    %9 = arith.mulf %8, %5 : vector<128x128xf32>
    %10 = arith.select %7, %5, %9 : vector<128x128xi1>, vector<128x128xf32>
    %11 = arith.truncf %10 : vector<128x128xf32> to vector<128x128xbf16>
    %c0_7 = arith.constant 0 : index
    %c0_8 = arith.constant 0 : index
    %12 = vector.load %arg5[%c0_7, %c0_8] : memref<128x128xbf16, #tpu.memory_space<vmem>>, vector<128x128xbf16>
    tpu.vector_store %arg5[%c0_7, %c0_8], %11 {strides = array<i32>} : memref<128x128xbf16, #tpu.memory_space<vmem>>, vector<128x128xbf16>,
    return
  }
  func.func @transform_0(%arg0: i32, %arg1: i32) -> (i32, i32) {
    %c0_i32 = arith.constant 0 : i32
    %c0_i32_0 = arith.constant 0 : i32
    return %arg0, %c0_i32 : i32, i32
  }
  func.func @transform_1(%arg0: i32, %arg1: i32) -> (i32, i32) {
    %c0_i32 = arith.constant 0 : i32
    %c0_i32_0 = arith.constant 0 : i32
    return %c0_i32, %arg1 : i32, i32
  }
  func.func @transform_2(%arg0: i32, %arg1: i32) -> (i32, i32) {
    %c0_i32 = arith.constant 0 : i32
    %c0_i32_0 = arith.constant 0 : i32
    return %c0_i32, %arg1 : i32, i32
  }
  func.func @transform_3(%arg0: i32, %arg1: i32) -> (i32, i32) {
    %c0_i32 = arith.constant 0 : i32
    return %arg0, %arg1 : i32, i32
  }
}

</mosaic_0001>

<bundles_post_ra>
// kernel: tpu_custom_call.1
= control target key start
LH: loop header
LB: loop body
LE: loop exit
PB: predicated region body
PF: predicated region fallthrough
CT: control target
= control target key end

     0   :  { %vm111_vm0 = vcmask 523264   ;;  %s655_s0 = inlined_call_operand.vmem [shape: bf16[128,64], index: 0, kind: input, shape index: {}]   ;;  %s656_s1 = inlined_call_operand.vmem [shape: bf16[64,128], index: 1, kind: input, shape index: {}]   ;;  %s657_s2 = inlined_call_operand.vmem [shape: f32[1,128], index: 2, kind: input, shape index: {}]   ;;  %s658_s3 = inlined_call_operand.hbm [shape: bf16[128,128], index: 3, kind: output, shape index: {}]  }
   0x1   :  { %v524_v0 = vld [vmem:[%s656_s1 + $0x18] sm:$0xff]   ;;  %v525_v1 = vld [vmem:[%s656_s1 + $0x10] sm:$0xff]   ;;  %v526_v2 = vld [vmem:[%s656_s1 + $0x8] sm:$0xff]  }
   0x2   :  { %489 = vmatprep.subr.bf16.mxu0 %v524_v0  ;;  %513 = vmatprep.subr.bf16.mxu1 %v524_v0  ;;  %v528_v3 = vld [vmem:[%s655_s0] sm:$0xff]  }
   0x3   :  { %490 = vmatpush3.bf16.msra.mxu0 %v524_v0  ;;  %517 = vmatpush3.bf16.msra.mxu1 %v524_v0  ;;  %v529_v4 = vld [vmem:[%s655_s0 + $0x20] sm:$0xff]  }
   0x4   :  { %491 = vmatprep.subr.bf16.mxu0 %v525_v1  ;;  %514 = vmatprep.subr.bf16.mxu1 %v525_v1  ;;  %v527_v5 = vld [vmem:[%s656_s1] sm:$0xff]  }
   0x5   :  { %497 = vmatprep.mubr.msk.bf16.mxu0 %vm111_vm0, %v528_v3  ;;  %505 = vmatprep.mubr.msk.bf16.mxu1 %vm111_vm0, %v529_v4 }
   0x7   :  { %492 = vmatpush3.bf16.msra.mxu0 %v525_v1  ;;  %518 = vmatpush3.bf16.msra.mxu1 %v525_v1 }
   0x8   :  { %493 = vmatprep.subr.bf16.mxu0 %v526_v2  ;;  %515 = vmatprep.subr.bf16.mxu1 %v526_v2 }
   0xb   :  { %494 = vmatpush3.bf16.msra.mxu0 %v526_v2  ;;  %519 = vmatpush3.bf16.msra.mxu1 %v526_v2 }
   0xc   :  { %495 = vmatprep.subr.bf16.mxu0 %v527_v5  ;;  %516 = vmatprep.subr.bf16.mxu1 %v527_v5 }
   0xd   :  { %8 = vsyncpa [#allocation3], 0  ;;  %v530_v6 = vld [vmem:[%s655_s0 + $0x8] sm:$0xff]   ;;  %v532_v8 = vld [vmem:[%s655_s0 + $0x10] sm:$0xff]  }
   0xe   :  { %v531_v7 = vld [vmem:[%s655_s0 + $0x28] sm:$0xff]   ;;  %v533_v9 = vld [vmem:[%s655_s0 + $0x30] sm:$0xff]   ;;  %v534_v10 = vld [vmem:[%s655_s0 + $0x18] sm:$0xff]  }
   0xf   :  { %496 = vmatpush3.bf16.msra.mxu0 %v527_v5  ;;  %520 = vmatpush3.bf16.msra.mxu1 %v527_v5  ;;  %v535_v11 = vld [vmem:[%s655_s0 + $0x38] sm:$0xff]   ;;  %v628_v12 = vld [vmem:[%s657_s2] ss:$0 sm:$0xff]  ;;  %s558_s0 = smov [#allocation2]  }
  0x10   :  { %s366_s2 = sshll.u32 %s558_s0, 4  ;;  %s367_s2 = int_to_ptr.vmem [resolvable:$true] %s366_s2 }
  0x11   :  { %s536_s10 = scalar_lea.vmem %s367_s2, 1024  ;;  %p541_p1 = scmp.lt.s32.totalorder %s367_s2, %s367_s2 }
  0x12   :  { %498 = vmatmul.mubr.msk.bf16.vlgmr.msra.gmra.mxu0 %vm111_vm0, %v530_v6  ;;  %506 = vmatmul.mubr.msk.bf16.vlgmr.msra.gmra.mxu1 %vm111_vm0, %v531_v7  ;;  %p537_p0 = scmp.ne.s32.totalorder %s367_s2, %s536_s10  ;;  %p542_p2 = scmp.lt.s32.totalorder %s536_s10, %s536_s10 }
  0x13   :  { %501 = vmatprep.mubr.msk.bf16.mxu0 %vm111_vm0, %v532_v8  ;;  %509 = vmatprep.mubr.msk.bf16.mxu1 %vm111_vm0, %v533_v9 }
  0x14   :  { %p543_p3 = por %p542_p2, %p541_p1 }
  0x16   :  { %p544_p4 = pnand %p543_p3, %p537_p0 }
  0x1a   :  { %502 = vmatmul.mubr.msk.bf16.gmra.mxu0 %vm111_vm0, %v534_v10  ;;  %510 = vmatmul.mubr.msk.bf16.gmra.mxu1 %vm111_vm0, %v535_v11 }
  0xd2   :  { %v499_v13 = vpop.f32.mrf.mxu0  ;;  %v507_v14 = vpop.f32.mrf.mxu1 }
  0xd3   :  { %v179_v15 = vadd.f32 %v499_v13, %v628_v12  ;;  %v211_v16 = vadd.f32 %v507_v14, %v628_v12 }
  0xd4   :  { %v170_v17 = vpop.f32.mrf.mxu0  ;;  %v202_v18 = vpop.f32.mrf.mxu1 }
  0xd5   :  { %vm235_vm1 = vcmp.gt.f32.partialorder %v179_v15, 0.0  ;;  %v251_v19 = vmul.f32 0.2, %v179_v15  ;;  %vm243_vm2 = vcmp.gt.f32.partialorder %v211_v16, 0.0  ;;  %v259_v20 = vmul.f32 0.2, %v211_v16 }
  0xd6   :  { %v171_v21 = vadd.f32 %v628_v12, %v170_v17  ;;  %v203_v22 = vadd.f32 %v628_v12, %v202_v18  ;;  %v500_v23 = vpop.f32.mrf.mxu0  ;;  %v508_v24 = vpop.f32.mrf.mxu1 }
  0xd7   :  { %v182_v25 = vadd.f32 %v500_v23, %v628_v12  ;;  %v214_v26 = vadd.f32 %v508_v24, %v628_v12  ;;  %v267_v27 = vsel %vm235_vm1, %v179_v15, %v251_v19  ;;  %v275_v28 = vsel %vm243_vm2, %v211_v16, %v259_v20 }
  0xd8   :  { %vm233_vm3 = vcmp.gt.f32.partialorder %v171_v21, 0.0  ;;  %v249_v29 = vmul.f32 0.2, %v171_v21  ;;  %v173_v30 = vpop.f32.mrf.mxu0  ;;  %v205_v31 = vpop.f32.mrf.mxu1  ;;  %vm241_vm6 = vcmp.gt.f32.partialorder %v203_v22, 0.0  ;;  %v257_v34 = vmul.f32 0.2, %v203_v22 }
  0xd9   :  { %vm236_vm4 = vcmp.gt.f32.partialorder %v182_v25, 0.0  ;;  %v252_v32 = vmul.f32 0.2, %v182_v25  ;;  %vm244_vm5 = vcmp.gt.f32.partialorder %v214_v26, 0.0  ;;  %v260_v33 = vmul.f32 0.2, %v214_v26 }
  0xda   :  { %v174_v35 = vadd.f32 %v628_v12, %v173_v30  ;;  %v206_v36 = vadd.f32 %v628_v12, %v205_v31  ;;  %v503_v37 = vpop.f32.mrf.mxu0  ;;  %v511_v38 = vpop.f32.mrf.mxu1  ;;  %v265_v49 = vsel %vm233_vm3, %v171_v21, %v249_v29  ;;  %v273_v54 = vsel %vm241_vm6, %v203_v22, %v257_v34 }
  0xdb   :  { %v268_v39 = vsel %vm236_vm4, %v182_v25, %v252_v32  ;;  %v276_v40 = vsel %vm244_vm5, %v214_v26, %v260_v33  ;;  %v195_v41 = vadd.f32 %v503_v37, %v628_v12  ;;  %v227_v42 = vadd.f32 %v511_v38, %v628_v12 }
  0xdc   :  { %v438_v43 = vpack.c.bf16 %v268_v39, %v267_v27  ;;  %v458_v44 = vpack.c.bf16 %v276_v40, %v275_v28  ;;  %vm234_vm7 = vcmp.gt.f32.partialorder %v174_v35, 0.0  ;;  %v250_v45 = vmul.f32 0.2, %v174_v35  ;;  %v186_v46 = vpop.f32.mrf.mxu0  ;;  %v218_v47 = vpop.f32.mrf.mxu1 }
  0xdd   :  { %vm242_vm8 = vcmp.gt.f32.partialorder %v206_v36, 0.0  ;;  %v258_v48 = vmul.f32 0.2, %v206_v36  ;;  %v187_v51 = vadd.f32 %v628_v12, %v186_v46  ;;  %v219_v57 = vadd.f32 %v628_v12, %v218_v47 }
  0xde   :  { %470 = vst [vmem:[#allocation2 + $0x8] sm:$0xff] %v438_v43   ;;  %474 = vst [vmem:[#allocation2 + $0x28] sm:$0xff] %v458_v44   ;;  %v266_v50 = vsel %vm234_vm7, %v174_v35, %v250_v45  ;;  %v504_v52 = vpop.f32.mrf.mxu0  ;;  %v512_v53 = vpop.f32.mrf.mxu1  ;;  %vm239_vm9 = vcmp.gt.f32.partialorder %v195_v41, 0.0  ;;  %v255_v59 = vmul.f32 0.2, %v195_v41  ;;  %vm247_vm10 = vcmp.gt.f32.partialorder %v227_v42, 0.0 }
  0xdf   :  { %v433_v55 = vpack.c.bf16 %v266_v50, %v265_v49  ;;  %v274_v56 = vsel %vm242_vm8, %v206_v36, %v258_v48  ;;  %v263_v62 = vmul.f32 0.2, %v227_v42  ;;  %vm237_vm11 = vcmp.gt.f32.partialorder %v187_v51, 0.0 }
  0xe0   :  { %v453_v58 = vpack.c.bf16 %v274_v56, %v273_v54  ;;  %v189_v60 = vpop.f32.mrf.mxu0  ;;  %v221_v61 = vpop.f32.mrf.mxu1  ;;  %v198_v63 = vadd.f32 %v504_v52, %v628_v12  ;;  %v230_v0 = vadd.f32 %v512_v53, %v628_v12  ;;  %v253_v1 = vmul.f32 0.2, %v187_v51 }
  0xe1   :  { %434 = vst [vmem:[#allocation2] sm:$0xff] %v433_v55   ;;  %vm245_vm12 = vcmp.gt.f32.partialorder %v219_v57, 0.0  ;;  %v190_v2 = vadd.f32 %v628_v12, %v189_v60  ;;  %v222_v3 = vadd.f32 %v628_v12, %v221_v61  ;;  %v261_v4 = vmul.f32 0.2, %v219_v57 }
  0xe2   :  { %473 = vst [vmem:[#allocation2 + $0x20] sm:$0xff] %v453_v58   ;;  %vm240_vm13 = vcmp.gt.f32.partialorder %v198_v63, 0.0  ;;  %v256_v5 = vmul.f32 0.2, %v198_v63  ;;  %vm248_vm14 = vcmp.gt.f32.partialorder %v230_v0, 0.0  ;;  %v271_v8 = vsel %vm239_vm9, %v195_v41, %v255_v59 }
  0xe3   :  { %v264_v6 = vmul.f32 0.2, %v230_v0  ;;  %vm238_vm15 = vcmp.gt.f32.partialorder %v190_v2, 0.0  ;;  %v254_v7 = vmul.f32 0.2, %v190_v2  ;;  %vm246_vm0 = vcmp.gt.f32.partialorder %v222_v3, 0.0 }
  0xe4   :  { %v279_v9 = vsel %vm247_vm10, %v227_v42, %v263_v62  ;;  %v272_v10 = vsel %vm240_vm13, %v198_v63, %v256_v5  ;;  %v262_v11 = vmul.f32 0.2, %v222_v3  ;;  %v269_v13 = vsel %vm237_vm11, %v187_v51, %v253_v1 }
  0xe5   :  { %v448_v14 = vpack.c.bf16 %v272_v10, %v271_v8  ;;  %v280_v12 = vsel %vm248_vm14, %v230_v0, %v264_v6  ;;  %v270_v15 = vsel %vm238_vm15, %v190_v2, %v254_v7  ;;  %v277_v16 = vsel %vm245_vm12, %v219_v57, %v261_v4 }
  0xe6   :  { %v468_v17 = vpack.c.bf16 %v280_v12, %v279_v9  ;;  %v443_v18 = vpack.c.bf16 %v270_v15, %v269_v13  ;;  %v278_v19 = vsel %vm246_vm0, %v222_v3, %v262_v11 }
  0xe7   :  { %472 = vst [vmem:[#allocation2 + $0x18] sm:$0xff] %v448_v14   ;;  %v463_v20 = vpack.c.bf16 %v278_v19, %v277_v16 }
  0xe8   :  { %476 = vst [vmem:[#allocation2 + $0x38] sm:$0xff] %v468_v17   ;;  %471 = vst [vmem:[#allocation2 + $0x10] sm:$0xff] %v443_v18  }
  0xe9   :  { %475 = vst [vmem:[#allocation2 + $0x30] sm:$0xff] %v463_v20  }
  0xea   :  { %547 = shalt.err (!%p544_p4)
}
  0xeb   :  { %s559_s11 = smov 64   ;;  %s560_s12 = smov 4  }
  0xec   :  { %372 = dma.vmem_to_hbm [thread:$0]  %s367_s2, 1024, %s658_s3, [#allocation3], %s559_s11, %s559_s11, %s560_s12  }
  0xed   :  { %556 = dma.done.wait [#allocation3], 1024  }
  0xee   :  { %557 = vsyncadd [#allocation3], 4294966272 }
  0xef   :  { %376 = vsyncpa [#allocation3], 1 }

</bundles_post_ra>
